<compile_context>
chip_gen: v5e
topology: v5e:2x2
jax: 0.10.0
libtpu: 0.0.40
codegen_flags: <defaults>
</compile_context>

<pallas_src>
import functools
import math

import jax
import jax.numpy as jnp
from jax.experimental import pallas as pl
from jax.experimental.pallas import tpu as pltpu


# ----------------------------------------------------------------------------
# Fused ClassBlock1 kernel
#   grid = (M / tm, K / tk), K last ("arbitrary"); both outputs are resident
#   across the K axis (their index_maps ignore k).
# ----------------------------------------------------------------------------
def _classblock1_kernel(x_ref, w1_ref, scale_ref, shift_ref, w2_ref, b2_ref,
                        out_ref, feat_ref, *, relu_slope):
    k = pl.program_id(1)

    @pl.when(k == 0)
    def _():
        feat_ref[...] = jnp.zeros_like(feat_ref)

    # First Linear: bf16 x bf16 -> f32, accumulated directly in the resident
    # f32 feature output block (no scratch accumulator).
    feat_ref[...] += jnp.dot(x_ref[...], w1_ref[...],
                             preferred_element_type=jnp.float32)

    @pl.when(k == pl.num_programs(1) - 1)
    def _():
        # Fused epilogue: Linear bias + inference BatchNorm1d folded into scale/shift.
        f = feat_ref[...] * scale_ref[...] + shift_ref[...]
        if relu_slope is not None:          # relu=False in the default ClassBlock1 config
            f = jnp.where(f > 0, f, relu_slope * f)
        # Dropout(p=0.5) -> identity at inference.
        feat_ref[...] = f
        # Second (classifier) Linear, fused in-kernel: (tm,512)bf16 @ (512,Cp)bf16 -> f32.
        out_ref[...] = (jnp.dot(f.astype(w2_ref.dtype), w2_ref[...],
                                preferred_element_type=jnp.float32)
                        + b2_ref[...])


def _round_up(x, m):
    return (x + m - 1) // m * m


def _pad2(a, rows, cols):
    pr, pc = rows - a.shape[0], cols - a.shape[1]
    if pr == 0 and pc == 0:
        return a
    return jnp.pad(a, ((0, pr), (0, pc)))


def class_block1_forward(params, x, *, return_f=False, relu=False):
    """x: (B, input_dim) f32 -> logits (B, class_num) f32 (and feature if return_f)."""
    M, D = x.shape
    NB = params['w1'].shape[1]            # num_bottleneck (512)
    C = params['w2'].shape[1]             # class_num
    assert NB % 128 == 0

    # Per-call tile selection (pad only when actually misaligned).
    tm = min(128, _round_up(M, 8))
    Mp = _round_up(M, tm)
    Dp = _round_up(D, 128)
    tk = max(t for t in (512, 256, 128) if Dp % t == 0)
    Cp = _round_up(C, 128)                # lane-dense classifier output
    k_blocks = Dp // tk

    x_p = _pad2(x.astype(jnp.bfloat16), Mp, Dp)
    w1_p = _pad2(params['w1'].astype(jnp.bfloat16), Dp, NB)
    w2_p = _pad2(params['w2'].astype(jnp.bfloat16), NB, Cp)
    scale = params['scale'].reshape(1, NB).astype(jnp.float32)
    shift = params['shift'].reshape(1, NB).astype(jnp.float32)
    b2_p = _pad2(params['b2'].reshape(1, C).astype(jnp.float32), 1, Cp)

    # Deeper buffering on the K-streaming operands only when the K loop is long.
    if k_blocks >= 4:
        x_spec = pl.BlockSpec((tm, tk), lambda i, k: (i, k),
                              pipeline_mode=pl.Buffered(3))
        w1_spec = pl.BlockSpec((tk, NB), lambda i, k: (k, 0),
                               pipeline_mode=pl.Buffered(3))
    else:
        x_spec = pl.BlockSpec((tm, tk), lambda i, k: (i, k))
        w1_spec = pl.BlockSpec((tk, NB), lambda i, k: (k, 0))

    out, feat = pl.pallas_call(
        functools.partial(_classblock1_kernel,
                          relu_slope=0.1 if relu else None),
        out_shape=(jax.ShapeDtypeStruct((Mp, Cp), jnp.float32),
                   jax.ShapeDtypeStruct((Mp, NB), jnp.float32)),
        grid_spec=pltpu.PrefetchScalarGridSpec(
            num_scalar_prefetch=0,
            grid=(Mp // tm, k_blocks),
            in_specs=[
                x_spec,                                        # x tile
                w1_spec,                                       # W1 tile
                pl.BlockSpec((1, NB), lambda i, k: (0, 0)),    # fused BN scale
                pl.BlockSpec((1, NB), lambda i, k: (0, 0)),    # fused BN shift
                pl.BlockSpec((NB, Cp), lambda i, k: (0, 0)),   # W2 (classifier)
                pl.BlockSpec((1, Cp), lambda i, k: (0, 0)),    # b2
            ],
            out_specs=(
                pl.BlockSpec((tm, Cp), lambda i, k: (i, 0)),   # logits
                pl.BlockSpec((tm, NB), lambda i, k: (i, 0)),   # bottleneck feature (also acc)
            )),
        compiler_params=pltpu.CompilerParams(
            dimension_semantics=("parallel", "arbitrary")),
    )(x_p, w1_p, scale, shift, w2_p, b2_p)

    logits = out[:M, :C]
    if return_f:
        return logits, feat[:M, :NB]
    return logits


# ----------------------------------------------------------------------------
# Deterministic synthetic parameters matching the PyTorch init semantics
# ----------------------------------------------------------------------------
def make_classblock1_params(key, input_dim, class_num, num_bottleneck=512, eps=1e-5):
    k1, k2, k3 = jax.random.split(key, 3)
    # Linear(input_dim, num_bottleneck): kaiming_normal_(mode='fan_out'), bias 0.
    # (stored pre-transposed: (input_dim, num_bottleneck))
    w1 = jax.random.normal(k1, (input_dim, num_bottleneck), jnp.float32) \
         * math.sqrt(2.0 / num_bottleneck)
    b1 = jnp.zeros((num_bottleneck,), jnp.float32)
    # BatchNorm1d: gamma ~ N(1, 0.02), beta = 0; running stats mean=0, var=1.
    gamma = 1.0 + 0.02 * jax.random.normal(k2, (num_bottleneck,), jnp.float32)
    beta = jnp.zeros((num_bottleneck,), jnp.float32)
    running_mean = jnp.zeros((num_bottleneck,), jnp.float32)
    running_var = jnp.ones((num_bottleneck,), jnp.float32)
    # classifier Linear(num_bottleneck, class_num): N(0, 0.001), bias 0.
    w2 = 0.001 * jax.random.normal(k3, (num_bottleneck, class_num), jnp.float32)
    b2 = jnp.zeros((class_num,), jnp.float32)
    # Fold Linear bias + inference BN into one scale/shift:
    #   BN(xW + b1) = (xW) * scale + shift
    inv_std = 1.0 / jnp.sqrt(running_var + eps)
    scale = gamma * inv_std
    shift = (b1 - running_mean) * scale + beta
    return {'w1': w1, 'w2': w2, 'b2': b2, 'scale': scale, 'shift': shift,
            # raw pieces kept for the pure-JAX reference
            'b1': b1, 'gamma': gamma, 'beta': beta,
            'running_mean': running_mean, 'running_var': running_var, 'eps': eps}


def class_block1_reference(params, x, *, relu=False):
    """Pure-JAX f32 reference of the inference forward pass."""
    z = x @ params['w1'] + params['b1']
    z = (z - params['running_mean']) / jnp.sqrt(params['running_var'] + params['eps'])
    z = z * params['gamma'] + params['beta']
    if relu:
        z = jnp.where(z > 0, z, 0.1 * z)
    # Dropout -> identity at inference.
    return z @ params['w2'] + params['b2']


# ----------------------------------------------------------------------------
if __name__ == "__main__":
    key = jax.random.PRNGKey(0)
    kp, kx = jax.random.split(key)

    batch, input_dim, class_num = 2, 1024, 32
    params = make_classblock1_params(kp, input_dim, class_num)
    x = jax.random.normal(kx, (batch, input_dim), jnp.float32)

    fwd = jax.jit(class_block1_forward)
    logits = jax.block_until_ready(fwd(params, x))

    assert logits.shape == (batch, class_num)
    assert bool(jnp.all(jnp.isfinite(logits)))

    # Correctness vs. pure-JAX f32 reference (bf16 operands / f32 accumulation).
    ref = class_block1_reference(params, x)
    rel = float(jnp.linalg.norm(logits - ref) / (jnp.linalg.norm(ref) + 1e-12))
    assert rel < 3e-2, f"relative error too high: {rel}"

    print("KERNEL_OK")
</pallas_src>

<mosaic_0001>
module attributes {stable_mosaic.version = 11 : i64} {
  func.func @_classblock1_kernel(%arg0: i32, %arg1: i32, %arg2: memref<8x512xbf16, #tpu.memory_space<vmem>>, %arg3: memref<512x512xbf16, #tpu.memory_space<vmem>>, %arg4: memref<1x512xf32, #tpu.memory_space<vmem>>, %arg5: memref<1x512xf32, #tpu.memory_space<vmem>>, %arg6: memref<512x128xbf16, #tpu.memory_space<vmem>>, %arg7: memref<1x128xf32, #tpu.memory_space<vmem>>, %arg8: memref<8x128xf32, #tpu.memory_space<vmem>>, %arg9: memref<8x512xf32, #tpu.memory_space<vmem>>) attributes {dimension_semantics = [#tpu.dimension_semantics<parallel>, #tpu.dimension_semantics<arbitrary>], iteration_bounds = array<i64: 1, 2>, scalar_prefetch = 0 : i64, scratch_operands = 0 : i64, tpu.core_type = #tpu.core_type<tc>, window_params = [{transform_indices = @transform_0, window_bounds = array<i64: 8, 512>}, {transform_indices = @transform_1, window_bounds = array<i64: 512, 512>}, {pipeline_mode = #tpu.pipeline_mode<synchronous>, transform_indices = @transform_2, window_bounds = array<i64: 1, 512>}, {pipeline_mode = #tpu.pipeline_mode<synchronous>, transform_indices = @transform_3, window_bounds = array<i64: 1, 512>}, {pipeline_mode = #tpu.pipeline_mode<synchronous>, transform_indices = @transform_4, window_bounds = array<i64: 512, 128>}, {pipeline_mode = #tpu.pipeline_mode<synchronous>, transform_indices = @transform_5, window_bounds = array<i64: 1, 128>}, {transform_indices = @transform_6, window_bounds = array<i64: 8, 128>}, {transform_indices = @transform_7, window_bounds = array<i64: 8, 512>}]} {
    %c0_i32 = arith.constant 0 : i32
    %0 = arith.cmpi eq, %arg1, %c0_i32 : i32
    %1 = arith.extui %0 : i1 to i32
    %c0_i32_0 = arith.constant 0 : i32
    %2 = arith.cmpi ne, %1, %c0_i32_0 : i32
    scf.if %2 {
      %cst_9 = arith.constant 0.000000e+00 : f32
      %12 = vector.broadcast %cst_9 : f32 to vector<8x512xf32>
      %c0_10 = arith.constant 0 : index
      %c0_11 = arith.constant 0 : index
      %13 = vector.load %arg9[%c0_10, %c0_11] : memref<8x512xf32, #tpu.memory_space<vmem>>, vector<8x512xf32>
      tpu.vector_store %arg9[%c0_10, %c0_11], %12 {strides = array<i32>} : memref<8x512xf32, #tpu.memory_space<vmem>>, vector<8x512xf32>,
    } else {
    }
    %c0 = arith.constant 0 : index
    %c0_1 = arith.constant 0 : index
    %3 = vector.load %arg9[%c0, %c0_1] : memref<8x512xf32, #tpu.memory_space<vmem>>, vector<8x512xf32>
    %c0_2 = arith.constant 0 : index
    %c0_3 = arith.constant 0 : index
    %4 = vector.load %arg2[%c0_2, %c0_3] : memref<8x512xbf16, #tpu.memory_space<vmem>>, vector<8x512xbf16>
    %c0_4 = arith.constant 0 : index
    %c0_5 = arith.constant 0 : index
    %5 = vector.load %arg3[%c0_4, %c0_5] : memref<512x512xbf16, #tpu.memory_space<vmem>>, vector<512x512xbf16>
    %cst = arith.constant dense<0.000000e+00> : vector<8x512xf32>
    %6 = tpu.matmul %4, %5, %cst {dimension_numbers = #tpu.dot_dimension_numbers<[1], [0], [0], [1], [0, 0, 1, 1], [], []>} : vector<8x512xbf16>, vector<512x512xbf16>, vector<8x512xf32> -> vector<8x512xf32>
    %7 = arith.addf %3, %6 : vector<8x512xf32>
    %c0_6 = arith.constant 0 : index
    %c0_7 = arith.constant 0 : index
    %8 = vector.load %arg9[%c0_6, %c0_7] : memref<8x512xf32, #tpu.memory_space<vmem>>, vector<8x512xf32>
    tpu.vector_store %arg9[%c0_6, %c0_7], %7 {strides = array<i32>} : memref<8x512xf32, #tpu.memory_space<vmem>>, vector<8x512xf32>,
    %c1_i32 = arith.constant 1 : i32
    %9 = arith.cmpi eq, %arg1, %c1_i32 : i32
    %10 = arith.extui %9 : i1 to i32
    %c0_i32_8 = arith.constant 0 : i32
    %11 = arith.cmpi ne, %10, %c0_i32_8 : i32
    scf.if %11 {
      %c0_9 = arith.constant 0 : index
      %c0_10 = arith.constant 0 : index
      %12 = vector.load %arg9[%c0_9, %c0_10] : memref<8x512xf32, #tpu.memory_space<vmem>>, vector<8x512xf32>
      %c0_11 = arith.constant 0 : index
      %c0_12 = arith.constant 0 : index
      %13 = vector.load %arg4[%c0_11, %c0_12] : memref<1x512xf32, #tpu.memory_space<vmem>>, vector<1x512xf32>
      %14 = vector.broadcast %13 : vector<1x512xf32> to vector<8x512xf32>
      %15 = arith.mulf %12, %14 : vector<8x512xf32>
      %c0_13 = arith.constant 0 : index
      %c0_14 = arith.constant 0 : index
      %16 = vector.load %arg5[%c0_13, %c0_14] : memref<1x512xf32, #tpu.memory_space<vmem>>, vector<1x512xf32>
      %17 = vector.broadcast %16 : vector<1x512xf32> to vector<8x512xf32>
      %18 = arith.addf %15, %17 : vector<8x512xf32>
      %c0_15 = arith.constant 0 : index
      %c0_16 = arith.constant 0 : index
      %19 = vector.load %arg9[%c0_15, %c0_16] : memref<8x512xf32, #tpu.memory_space<vmem>>, vector<8x512xf32>
      tpu.vector_store %arg9[%c0_15, %c0_16], %18 {strides = array<i32>} : memref<8x512xf32, #tpu.memory_space<vmem>>, vector<8x512xf32>,
      %20 = arith.truncf %18 : vector<8x512xf32> to vector<8x512xbf16>
      %c0_17 = arith.constant 0 : index
      %c0_18 = arith.constant 0 : index
      %21 = vector.load %arg6[%c0_17, %c0_18] : memref<512x128xbf16, #tpu.memory_space<vmem>>, vector<512x128xbf16>
      %cst_19 = arith.constant dense<0.000000e+00> : vector<8x128xf32>
      %22 = tpu.matmul %20, %21, %cst_19 {dimension_numbers = #tpu.dot_dimension_numbers<[1], [0], [0], [1], [0, 0, 1, 1], [], []>} : vector<8x512xbf16>, vector<512x128xbf16>, vector<8x128xf32> -> vector<8x128xf32>
      %c0_20 = arith.constant 0 : index
      %c0_21 = arith.constant 0 : index
      %23 = vector.load %arg7[%c0_20, %c0_21] : memref<1x128xf32, #tpu.memory_space<vmem>>, vector<1x128xf32>
      %24 = vector.broadcast %23 : vector<1x128xf32> to vector<8x128xf32>
      %25 = arith.addf %22, %24 : vector<8x128xf32>
      %c0_22 = arith.constant 0 : index
      %c0_23 = arith.constant 0 : index
      %26 = vector.load %arg8[%c0_22, %c0_23] : memref<8x128xf32, #tpu.memory_space<vmem>>, vector<8x128xf32>
      tpu.vector_store %arg8[%c0_22, %c0_23], %25 {strides = array<i32>} : memref<8x128xf32, #tpu.memory_space<vmem>>, vector<8x128xf32>,
    } else {
    }
    return
  }
  func.func @transform_0(%arg0: i32, %arg1: i32) -> (i32, i32) {
    %c0_i32 = arith.constant 0 : i32
    return %arg0, %arg1 : i32, i32
  }
  func.func @transform_1(%arg0: i32, %arg1: i32) -> (i32, i32) {
    %c0_i32 = arith.constant 0 : i32
    %c0_i32_0 = arith.constant 0 : i32
    return %arg1, %c0_i32 : i32, i32
  }
  func.func @transform_2(%arg0: i32, %arg1: i32) -> (i32, i32) {
    %c0_i32 = arith.constant 0 : i32
    %c0_i32_0 = arith.constant 0 : i32
    %c0_i32_1 = arith.constant 0 : i32
    return %c0_i32, %c0_i32_0 : i32, i32
  }
  func.func @transform_3(%arg0: i32, %arg1: i32) -> (i32, i32) {
    %c0_i32 = arith.constant 0 : i32
    %c0_i32_0 = arith.constant 0 : i32
    %c0_i32_1 = arith.constant 0 : i32
    return %c0_i32, %c0_i32_0 : i32, i32
  }
  func.func @transform_4(%arg0: i32, %arg1: i32) -> (i32, i32) {
    %c0_i32 = arith.constant 0 : i32
    %c0_i32_0 = arith.constant 0 : i32
    %c0_i32_1 = arith.constant 0 : i32
    return %c0_i32, %c0_i32_0 : i32, i32
  }
  func.func @transform_5(%arg0: i32, %arg1: i32) -> (i32, i32) {
    %c0_i32 = arith.constant 0 : i32
    %c0_i32_0 = arith.constant 0 : i32
    %c0_i32_1 = arith.constant 0 : i32
    return %c0_i32, %c0_i32_0 : i32, i32
  }
  func.func @transform_6(%arg0: i32, %arg1: i32) -> (i32, i32) {
    %c0_i32 = arith.constant 0 : i32
    %c0_i32_0 = arith.constant 0 : i32
    return %arg0, %c0_i32 : i32, i32
  }
  func.func @transform_7(%arg0: i32, %arg1: i32) -> (i32, i32) {
    %c0_i32 = arith.constant 0 : i32
    %c0_i32_0 = arith.constant 0 : i32
    return %arg0, %c0_i32 : i32, i32
  }
}

</mosaic_0001>

<bundles_post_ra>
// kernel: class_block1_forward.1
= control target key start
LH: loop header
LB: loop body
LE: loop exit
PB: predicated region body
PF: predicated region fallthrough
CT: control target
= control target key end

     0   :  { %13 = vsyncpa [#allocation3], 0  ;;  %s2759_s24 = smov 0   ;;  %s2761_s25 = smov 0   ;;  %s3198_s0 = inlined_call_operand.vmem [shape: bf16[8,1024], index: 0, kind: input, shape index: {}]   ;;  %s3199_s1 = inlined_call_operand.vmem [shape: bf16[1024,512], index: 1, kind: input, shape index: {}]   ;;  %s3200_s2 = inlined_call_operand.vmem [shape: f32[1,512], index: 2, kind: input, shape index: {}]   ;;  %s3201_s3 = inlined_call_operand.vmem [shape: f32[1,512], index: 3, kind: input, shape index: {}]   ;;  %s3202_s4 = inlined_call_operand.vmem [shape: bf16[512,128], index: 4, kind: input, shape index: {}]   ;;  %s3203_s5 = inlined_call_operand.vmem [shape: f32[1,128], index: 5, kind: input, shape index: {}]   ;;  %s3204_s6 = inlined_call_operand.vmem [shape: f32[8,128], index: 6, kind: output, shape index: {0}]   ;;  %s3205_s7 = inlined_call_operand.hbm [shape: f32[8,512], index: 7, kind: output, shape index: {1}]  }
   0x1   :  { %s2763_s26 = smov 0  }
   0x2 LB: > { %s1811_s27 = sadd.s32 4294967295, %s2715_s26   ;;  %s28_s28 = sadd.s32 1, %s2711_s25  ;;  %s2715_s26 = sphi %s2763_s26, %s19_s26   ;;  %s2711_s25 = sphi %s2761_s25, %s3207_s25   ;;  %s2707_s24 = sphi %s2759_s24, %s3206_s24  }
   0x3   : > { %p29_p0 = scmp.ge.s32.totalorder %s28_s28, 2  ;;  %p1814_p1 = scmp.ge.s32.totalorder %s2715_s26, 1 }
   0x4   : > { %p272_p2 = scmp.lt.s32.totalorder %s2715_s26, 3 }
   0x5   : > { %s3209_s28 = smov (%p29_p0, %s28_s28), 0 }
   0x6   : > { %p273_p3 = pnand %p1814_p1, %p272_p2 }
   0x7   : > { %s1815_s29 = sshll.u32 (!%p273_p3), %s2707_s24, 2  ;;  %s1817_s30 = sshll.u32 (!%p273_p3), %s2707_s24, 6 }
   0x8   : > { %276 = sbr.rel (%p273_p3) target bundleno = 480 (0x1e0), region = 44  ;;  %p316_p4 = scmp.lt.s32.totalorder (!%p273_p3), %s1815_s29, 7 }
   0x9   : > { %p324_p5 = scmp.lt.s32.totalorder (!%p273_p3), %s1817_s30, 127  ;;  %p1820_p6 = scmp.ne.s32.totalorder (!%p273_p3), %s2707_s24, 0 }
   0xd   : > { %s3211_s29 = smov (!%p316_p4, %s1815_s29), 7  ;;  %s3213_s30 = smov (!%p324_p5, %s1817_s30), 127 }
   0xe   : > { %s1816_s8 = sshll.u32 %s3211_s29, 2  ;;  %s2467_s12 = sshll.u32 %s3213_s30, 4 }
   0xf   : > { %s2785_s11 = scalar_lea.vmem %s3198_s0, %s1816_s8  ;;  %s2790_s15 = scalar_lea.vmem %s3199_s1, %s2467_s12 }
  0x10   : > { %337 = sbr.rel (%p1820_p6) target bundleno = 26 (0x1a), region = 48 }
  0x15   : > { %v2717_v0 = vmov 0.0  }
  0x16   : > { %338 = vst [vmem:[#allocation2] sm:$0xff] %v2717_v0 }
  0x17   : > { %339 = vst [vmem:[#allocation2 + $0x8] sm:$0xff] %v2717_v0 }
  0x18   : > { %340 = vst [vmem:[#allocation2 + $0x10] sm:$0xff] %v2717_v0 }
  0x19   : > { %341 = vst [vmem:[#allocation2 + $0x18] sm:$0xff] %v2717_v0 }
  0x1a PF: > { %v1935_v1 = vld [vmem:[%s2790_s15 + $0xe0] sm:$0xf]  ;;  %v2498_v2 = vld [vmem:[%s2790_s15 + $0xec] sm:$0xf0]  ;;  %p2333_p7 = scmp.ne.s32.totalorder %s2707_s24, 1 }
  0x1b   : > { %v2063_v3 = vld [vmem:[%s2790_s15 + $0x1e0] sm:$0xf]  ;;  %v1936_v4 = vor.u32 %v2498_v2, %v1935_v1  ;;  %v2530_v5 = vld [vmem:[%s2790_s15 + $0x1ec] sm:$0xf0] }
  0x1c   : > { %v2191_v6 = vld [vmem:[%s2790_s15 + $0x2e0] sm:$0xf]  ;;  %v2562_v7 = vld [vmem:[%s2790_s15 + $0x2ec] sm:$0xf0]  ;;  %v2064_v8 = vor.u32 %v2530_v5, %v2063_v3 }
  0x1d   : > { %v2192_v9 = vor.u32 %v2562_v7, %v2191_v6  ;;  %v2319_v10 = vld [vmem:[%s2790_s15 + $0x3e0] sm:$0xf]  ;;  %v2594_v11 = vld [vmem:[%s2790_s15 + $0x3ec] sm:$0xf0]  ;;  %1130 = vmatpush.bf16.msra.mxu0 %v1936_v4 }
  0x1e   : > { %v1919_v12 = vld [vmem:[%s2790_s15 + $0xc0] sm:$0xf]  ;;  %v2320_v13 = vor.u32 %v2594_v11, %v2319_v10  ;;  %v2494_v14 = vld [vmem:[%s2790_s15 + $0xcc] sm:$0xf0]  ;;  %1143 = vmatpush.bf16.msra.mxu1 %v2064_v8 }
  0x1f   : > { %v2047_v15 = vld [vmem:[%s2790_s15 + $0x1c0] sm:$0xf]  ;;  %v2526_v16 = vld [vmem:[%s2790_s15 + $0x1cc] sm:$0xf0]  ;;  %1156 = vmatpush.bf16.msra.mxu2 %v2192_v9  ;;  %v1920_v17 = vor.u32 %v2494_v14, %v1919_v12 }
  0x20   : > { %v2048_v18 = vor.u32 %v2526_v16, %v2047_v15  ;;  %v2175_v19 = vld [vmem:[%s2790_s15 + $0x2c0] sm:$0xf]  ;;  %v2558_v20 = vld [vmem:[%s2790_s15 + $0x2cc] sm:$0xf0]  ;;  %1169 = vmatpush.bf16.msra.mxu3 %v2320_v13 }
  0x21   : > { %v2303_v21 = vld [vmem:[%s2790_s15 + $0x3c0] sm:$0xf]  ;;  %v2176_v22 = vor.u32 %v2558_v20, %v2175_v19  ;;  %v2590_v23 = vld [vmem:[%s2790_s15 + $0x3cc] sm:$0xf0]  ;;  %1131 = vmatpush.bf16.msra.mxu0 %v1920_v17 }
  0x22   : > { %v1903_v24 = vld [vmem:[%s2790_s15 + $0xa0] sm:$0xf]  ;;  %v2490_v25 = vld [vmem:[%s2790_s15 + $0xac] sm:$0xf0]  ;;  %v2304_v26 = vor.u32 %v2590_v23, %v2303_v21  ;;  %1144 = vmatpush.bf16.msra.mxu1 %v2048_v18 }
  0x23   : > { %v2031_v27 = vld [vmem:[%s2790_s15 + $0x1a0] sm:$0xf]  ;;  %v2522_v28 = vld [vmem:[%s2790_s15 + $0x1ac] sm:$0xf0]  ;;  %v1904_v30 = vor.u32 %v2490_v25, %v1903_v24  ;;  %1157 = vmatpush.bf16.msra.mxu2 %v2176_v22 }
  0x24   : > { %v2159_v29 = vld [vmem:[%s2790_s15 + $0x2a0] sm:$0xf]  ;;  %v2554_v31 = vld [vmem:[%s2790_s15 + $0x2ac] sm:$0xf0]  ;;  %v2032_v34 = vor.u32 %v2522_v28, %v2031_v27  ;;  %1170 = vmatpush.bf16.msra.mxu3 %v2304_v26 }
  0x25   : > { %v2287_v32 = vld [vmem:[%s2790_s15 + $0x3a0] sm:$0xf]  ;;  %v2586_v33 = vld [vmem:[%s2790_s15 + $0x3ac] sm:$0xf0]  ;;  %v2160_v35 = vor.u32 %v2554_v31, %v2159_v29  ;;  %1132 = vmatpush.bf16.msra.mxu0 %v1904_v30  ;;  %v2496_v29 = vld [vmem:[%s2790_s15 + $0xe4] sm:$0xf] }
  0x26   : > { %v1887_v36 = vld [vmem:[%s2790_s15 + $0x80] sm:$0xf]  ;;  %v2486_v37 = vld [vmem:[%s2790_s15 + $0x8c] sm:$0xf0]  ;;  %v2288_v39 = vor.u32 %v2586_v33, %v2287_v32  ;;  %1145 = vmatpush.bf16.msra.mxu1 %v2032_v34  ;;  %v1937_v30 = vld [vmem:[%s2790_s15 + $0xf0] sm:$0xf0] }
  0x27   : > { %v2015_v38 = vld [vmem:[%s2790_s15 + $0x180] sm:$0xf]  ;;  %v2518_v40 = vld [vmem:[%s2790_s15 + $0x18c] sm:$0xf0]  ;;  %v1888_v45 = vor.u32 %v2486_v37, %v1887_v36  ;;  %1158 = vmatpush.bf16.msra.mxu2 %v2160_v35  ;;  %v2528_v31 = vld [vmem:[%s2790_s15 + $0x1e4] sm:$0xf] }
  0x28   : > { %v2143_v41 = vld [vmem:[%s2790_s15 + $0x280] sm:$0xf]  ;;  %v2550_v42 = vld [vmem:[%s2790_s15 + $0x28c] sm:$0xf0]  ;;  %v2016_v46 = vor.u32 %v2518_v40, %v2015_v38  ;;  %1171 = vmatpush.bf16.msra.mxu3 %v2288_v39  ;;  %v2065_v33 = vld [vmem:[%s2790_s15 + $0x1f0] sm:$0xf0] }
  0x29   : > { %v2271_v43 = vld [vmem:[%s2790_s15 + $0x380] sm:$0xf]  ;;  %v2582_v44 = vld [vmem:[%s2790_s15 + $0x38c] sm:$0xf0]  ;;  %v2144_v47 = vor.u32 %v2550_v42, %v2143_v41  ;;  %1133 = vmatpush.bf16.msra.mxu0 %v1888_v45  ;;  %v2560_v34 = vld [vmem:[%s2790_s15 + $0x2e4] sm:$0xf]  ;;  %v1940_v41 = vor.u32 %v2496_v29, %v1937_v30  ;;  %v2068_v42 = vor.u32 %v2528_v31, %v2065_v33 }
  0x2a   : > { %v1871_v48 = vld [vmem:[%s2790_s15 + $0x60] sm:$0xf]  ;;  %v2482_v49 = vld [vmem:[%s2790_s15 + $0x6c] sm:$0xf0]  ;;  %v2272_v51 = vor.u32 %v2582_v44, %v2271_v43  ;;  %1146 = vmatpush.bf16.msra.mxu1 %v2016_v46  ;;  %v2193_v35 = vld [vmem:[%s2790_s15 + $0x2f0] sm:$0xf0] }
  0x2b   : > { %v1999_v50 = vld [vmem:[%s2790_s15 + $0x160] sm:$0xf]  ;;  %v2514_v52 = vld [vmem:[%s2790_s15 + $0x16c] sm:$0xf0]  ;;  %v1872_v57 = vor.u32 %v2482_v49, %v1871_v48  ;;  %1159 = vmatpush.bf16.msra.mxu2 %v2144_v47  ;;  %v2592_v38 = vld [vmem:[%s2790_s15 + $0x3e4] sm:$0xf]  ;;  %v2196_v43 = vor.u32 %v2560_v34, %v2193_v35 }
  0x2c   : > { %v2127_v53 = vld [vmem:[%s2790_s15 + $0x260] sm:$0xf]  ;;  %v2546_v54 = vld [vmem:[%s2790_s15 + $0x26c] sm:$0xf0]  ;;  %v2000_v58 = vor.u32 %v2514_v52, %v1999_v50  ;;  %1172 = vmatpush.bf16.msra.mxu3 %v2272_v51  ;;  %v2321_v39 = vld [vmem:[%s2790_s15 + $0x3f0] sm:$0xf0] }
  0x2d   : > { %v2255_v55 = vld [vmem:[%s2790_s15 + $0x360] sm:$0xf]  ;;  %v2578_v56 = vld [vmem:[%s2790_s15 + $0x36c] sm:$0xf0]  ;;  %v2128_v59 = vor.u32 %v2546_v54, %v2127_v53  ;;  %1134 = vmatpush.bf16.msra.mxu0 %v1872_v57  ;;  %v2492_v44 = vld [vmem:[%s2790_s15 + $0xc4] sm:$0xf]  ;;  %v2324_v47 = vor.u32 %v2592_v38, %v2321_v39 }
  0x2e   : > { %v1855_v60 = vld [vmem:[%s2790_s15 + $0x40] sm:$0xf]  ;;  %v2478_v61 = vld [vmem:[%s2790_s15 + $0x4c] sm:$0xf0]  ;;  %v2256_v63 = vor.u32 %v2578_v56, %v2255_v55  ;;  %1147 = vmatpush.bf16.msra.mxu1 %v2000_v58  ;;  %v1921_v45 = vld [vmem:[%s2790_s15 + $0xd0] sm:$0xf0] }
  0x2f   : > { %v1983_v62 = vld [vmem:[%s2790_s15 + $0x140] sm:$0xf]  ;;  %v2510_v0 = vld [vmem:[%s2790_s15 + $0x14c] sm:$0xf0]  ;;  %v1856_v5 = vor.u32 %v2478_v61, %v1855_v60  ;;  %1160 = vmatpush.bf16.msra.mxu2 %v2128_v59  ;;  %v2524_v46 = vld [vmem:[%s2790_s15 + $0x1c4] sm:$0xf]  ;;  %v1924_v53 = vor.u32 %v2492_v44, %v1921_v45 }
  0x30   : > { %v2111_v1 = vld [vmem:[%s2790_s15 + $0x240] sm:$0xf]  ;;  %v2542_v2 = vld [vmem:[%s2790_s15 + $0x24c] sm:$0xf0]  ;;  %v1984_v6 = vor.u32 %v2510_v0, %v1983_v62  ;;  %1173 = vmatpush.bf16.msra.mxu3 %v2256_v63  ;;  %v2049_v48 = vld [vmem:[%s2790_s15 + $0x1d0] sm:$0xf0] }
  0x31   : > { %v2239_v3 = vld [vmem:[%s2790_s15 + $0x340] sm:$0xf]  ;;  %v2574_v4 = vld [vmem:[%s2790_s15 + $0x34c] sm:$0xf0]  ;;  %v2112_v7 = vor.u32 %v2542_v2, %v2111_v1  ;;  %1135 = vmatpush.bf16.msra.mxu0 %v1856_v5  ;;  %v2556_v49 = vld [vmem:[%s2790_s15 + $0x2c4] sm:$0xf]  ;;  %v2052_v54 = vor.u32 %v2524_v46, %v2049_v48 }
  0x32   : > { %v1839_v8 = vld [vmem:[%s2790_s15 + $0x20] sm:$0xf]  ;;  %v2474_v9 = vld [vmem:[%s2790_s15 + $0x2c] sm:$0xf0]  ;;  %v2240_v11 = vor.u32 %v2574_v4, %v2239_v3  ;;  %1148 = vmatpush.bf16.msra.mxu1 %v1984_v6  ;;  %v2177_v50 = vld [vmem:[%s2790_s15 + $0x2d0] sm:$0xf0] }
  0x33   : > { %v1967_v10 = vld [vmem:[%s2790_s15 + $0x120] sm:$0xf]  ;;  %v2506_v12 = vld [vmem:[%s2790_s15 + $0x12c] sm:$0xf0]  ;;  %v1840_v17 = vor.u32 %v2474_v9, %v1839_v8  ;;  %1161 = vmatpush.bf16.msra.mxu2 %v2112_v7  ;;  %v2588_v51 = vld [vmem:[%s2790_s15 + $0x3c4] sm:$0xf]  ;;  %v2180_v55 = vor.u32 %v2556_v49, %v2177_v50 }
  0x34   : > { %v2095_v13 = vld [vmem:[%s2790_s15 + $0x220] sm:$0xf]  ;;  %v2538_v14 = vld [vmem:[%s2790_s15 + $0x22c] sm:$0xf0]  ;;  %v1968_v20 = vor.u32 %v2506_v12, %v1967_v10  ;;  %1174 = vmatpush.bf16.msra.mxu3 %v2240_v11  ;;  %v2305_v52 = vld [vmem:[%s2790_s15 + $0x3d0] sm:$0xf0] }
  0x35   : > { %v2223_v15 = vld [vmem:[%s2790_s15 + $0x320] sm:$0xf]  ;;  %v2570_v16 = vld [vmem:[%s2790_s15 + $0x32c] sm:$0xf0]  ;;  %v2096_v21 = vor.u32 %v2538_v14, %v2095_v13  ;;  %1136 = vmatpush.bf16.msra.mxu0 %v1840_v17  ;;  %v2488_v56 = vld [vmem:[%s2790_s15 + $0xa4] sm:$0xf]  ;;  %v2308_v59 = vor.u32 %v2588_v51, %v2305_v52 }
  0x36   : > { %v1823_v18 = vld [vmem:[%s2790_s15] sm:$0xf]  ;;  %v2470_v19 = vld [vmem:[%s2790_s15 + $0xc] sm:$0xf0]  ;;  %v2224_v25 = vor.u32 %v2570_v16, %v2223_v15  ;;  %1149 = vmatpush.bf16.msra.mxu1 %v1968_v20  ;;  %v1905_v57 = vld [vmem:[%s2790_s15 + $0xb0] sm:$0xf0] }
  0x37   : > { %v1951_v22 = vld [vmem:[%s2790_s15 + $0x100] sm:$0xf]  ;;  %v2502_v23 = vld [vmem:[%s2790_s15 + $0x10c] sm:$0xf0]  ;;  %v1824_v32 = vor.u32 %v2470_v19, %v1823_v18  ;;  %1162 = vmatpush.bf16.msra.mxu2 %v2096_v21  ;;  %v2520_v58 = vld [vmem:[%s2790_s15 + $0x1a4] sm:$0xf]  ;;  %v1908_v1 = vor.u32 %v2488_v56, %v1905_v57 }
  0x38   : > { %v2079_v24 = vld [vmem:[%s2790_s15 + $0x200] sm:$0xf]  ;;  %v2534_v26 = vld [vmem:[%s2790_s15 + $0x20c] sm:$0xf0]  ;;  %v1952_v36 = vor.u32 %v2502_v23, %v1951_v22  ;;  %1175 = vmatpush.bf16.msra.mxu3 %v2224_v25  ;;  %v2033_v60 = vld [vmem:[%s2790_s15 + $0x1b0] sm:$0xf0] }
  0x39   : > { %v2207_v27 = vld [vmem:[%s2790_s15 + $0x300] sm:$0xf]  ;;  %v2566_v28 = vld [vmem:[%s2790_s15 + $0x30c] sm:$0xf0]  ;;  %v2080_v37 = vor.u32 %v2534_v26, %v2079_v24  ;;  %1137 = vmatpush.bf16.msra.mxu0 %v1824_v32  ;;  %v2552_v61 = vld [vmem:[%s2790_s15 + $0x2a4] sm:$0xf]  ;;  %v2036_v3 = vor.u32 %v2520_v58, %v2033_v60 }
  0x3a   : > { %v2208_v40 = vor.u32 %v2566_v28, %v2207_v27  ;;  %1150 = vmatpush.bf16.msra.mxu1 %v1952_v36  ;;  %v2161_v62 = vld [vmem:[%s2790_s15 + $0x2b0] sm:$0xf0]  ;;  %v2584_v63 = vld [vmem:[%s2790_s15 + $0x3a4] sm:$0xf]  ;;  %v347_v2 = vld [vmem:[%s2785_s11 + $0x8] sm:$0xff] }
  0x3b   : > { %1163 = vmatpush.bf16.msra.mxu2 %v2080_v37  ;;  %v2289_v0 = vld [vmem:[%s2790_s15 + $0x3b0] sm:$0xf0]  ;;  %v2164_v4 = vor.u32 %v2552_v61, %v2161_v62  ;;  %v2484_v5 = vld [vmem:[%s2790_s15 + $0x84] sm:$0xf]  ;;  %v480_v8 = vunpack.c.l.b16 %v347_v2  ;;  %v481_v9 = vunpack.c.h.b16 %v347_v2 }
  0x3c   : > { %1176 = vmatpush.bf16.msra.mxu3 %v2208_v40  ;;  %v1889_v6 = vld [vmem:[%s2790_s15 + $0x90] sm:$0xf0]  ;;  %v2516_v7 = vld [vmem:[%s2790_s15 + $0x184] sm:$0xf]  ;;  %v2292_v10 = vor.u32 %v2584_v63, %v2289_v0 }
  0x3d   : > { %1182 = vmatpush.bf16.msrb.mxu0 %v1940_v41  ;;  %v2017_v11 = vld [vmem:[%s2790_s15 + $0x190] sm:$0xf0]  ;;  %v2548_v12 = vld [vmem:[%s2790_s15 + $0x284] sm:$0xf]  ;;  %v2890_v16 = vpack.c.b16 %v480_v8, %v480_v8  ;;  %v2892_v17 = vpack.c.b16 %v481_v9, %v481_v9  ;;  %v1892_v19 = vor.u32 %v2484_v5, %v1889_v6  ;;  %v2499_v8 = vld [vmem:[%s2790_s15 + $0xf4] sm:$0xf0] }
  0x3e   : > { %1195 = vmatpush.bf16.msrb.mxu1 %v2068_v42  ;;  %v2145_v13 = vld [vmem:[%s2790_s15 + $0x290] sm:$0xf0]  ;;  %v2580_v14 = vld [vmem:[%s2790_s15 + $0x384] sm:$0xf]  ;;  %v2020_v22 = vor.u32 %v2516_v7, %v2017_v11  ;;  %v1943_v7 = vld [vmem:[%s2790_s15 + $0xe8] sm:$0xf] }
  0x3f   : > { %1208 = vmatpush.bf16.msrb.mxu2 %v2196_v43  ;;  %v2273_v15 = vld [vmem:[%s2790_s15 + $0x390] sm:$0xf0]  ;;  %v346_v18 = vld [vmem:[%s2785_s11] sm:$0xff]  ;;  %v2148_v23 = vor.u32 %v2548_v12, %v2145_v13  ;;  %1177 = vmatmul.bf16.vlgmr.msra.gmra.mxu3 %v2892_v17  ;;  %v2071_v9 = vld [vmem:[%s2790_s15 + $0x1e8] sm:$0xf] }
  0x40   : > { %1221 = vmatpush.bf16.msrb.mxu3 %v2324_v47  ;;  %v478_v20 = vunpack.c.l.b16 %v346_v18  ;;  %v479_v21 = vunpack.c.h.b16 %v346_v18  ;;  %v2480_v24 = vld [vmem:[%s2790_s15 + $0x64] sm:$0xf]  ;;  %v1873_v25 = vld [vmem:[%s2790_s15 + $0x70] sm:$0xf0]  ;;  %v2276_v27 = vor.u32 %v2580_v14, %v2273_v15  ;;  %1164 = vmatmul.bf16.vlgmr.msra.gmra.mxu2 %v2890_v16  ;;  %v2531_v11 = vld [vmem:[%s2790_s15 + $0x1f4] sm:$0xf0] }
  0x41   : > { %1183 = vmatpush.bf16.msrb.mxu0 %v1924_v53  ;;  %v2512_v26 = vld [vmem:[%s2790_s15 + $0x164] sm:$0xf]  ;;  %v2001_v28 = vld [vmem:[%s2790_s15 + $0x170] sm:$0xf0]  ;;  %v1876_v35 = vor.u32 %v2480_v24, %v1873_v25  ;;  %v2199_v12 = vld [vmem:[%s2790_s15 + $0x2e8] sm:$0xf] }
  0x42   : > { %1196 = vmatpush.bf16.msrb.mxu1 %v2052_v54  ;;  %v2544_v29 = vld [vmem:[%s2790_s15 + $0x264] sm:$0xf]  ;;  %v2129_v30 = vld [vmem:[%s2790_s15 + $0x270] sm:$0xf0]  ;;  %v2902_v31 = vpack.c.b16 %v478_v20, %v478_v20  ;;  %v2904_v32 = vpack.c.b16 %v479_v21, %v479_v21  ;;  %v2004_v36 = vor.u32 %v2512_v26, %v2001_v28  ;;  %v2563_v13 = vld [vmem:[%s2790_s15 + $0x2f4] sm:$0xf0]  ;;  %v1944_v21 = vor.u32 %v2499_v8, %v1943_v7 }
  0x43   : > { %1209 = vmatpush.bf16.msrb.mxu2 %v2180_v55  ;;  %v2576_v33 = vld [vmem:[%s2790_s15 + $0x364] sm:$0xf]  ;;  %v2257_v34 = vld [vmem:[%s2790_s15 + $0x370] sm:$0xf0]  ;;  %v2132_v37 = vor.u32 %v2544_v29, %v2129_v30  ;;  %v2327_v18 = vld [vmem:[%s2790_s15 + $0x3e8] sm:$0xf] }
  0x44   : > { %1222 = vmatpush.bf16.msrb.mxu3 %v2308_v59  ;;  %1151 = vmatmul.bf16.vlgmr.msra.gmra.mxu1 %v2904_v32  ;;  %v2476_v38 = vld [vmem:[%s2790_s15 + $0x44] sm:$0xf]  ;;  %v1857_v39 = vld [vmem:[%s2790_s15 + $0x50] sm:$0xf0]  ;;  %v2260_v41 = vor.u32 %v2576_v33, %v2257_v34  ;;  %v1927_v24 = vld [vmem:[%s2790_s15 + $0xc8] sm:$0xf] }
  0x45   : > { %1184 = vmatpush.bf16.msrb.mxu0 %v1908_v1  ;;  %v2508_v40 = vld [vmem:[%s2790_s15 + $0x144] sm:$0xf]  ;;  %v1985_v42 = vld [vmem:[%s2790_s15 + $0x150] sm:$0xf0]  ;;  %v1860_v47 = vor.u32 %v2476_v38, %v1857_v39  ;;  %v2495_v25 = vld [vmem:[%s2790_s15 + $0xd4] sm:$0xf0] }
  0x46   : > { %1197 = vmatpush.bf16.msrb.mxu1 %v2036_v3  ;;  %v2540_v43 = vld [vmem:[%s2790_s15 + $0x244] sm:$0xf]  ;;  %v2113_v44 = vld [vmem:[%s2790_s15 + $0x250] sm:$0xf0]  ;;  %1138 = vmatmul.bf16.vlgmr.msra.gmra.mxu0 %v2902_v31  ;;  %v1988_v48 = vor.u32 %v2508_v40, %v1985_v42  ;;  %v2055_v26 = vld [vmem:[%s2790_s15 + $0x1c8] sm:$0xf] }
  0x47   : > { %1210 = vmatpush.bf16.msrb.mxu2 %v2164_v4  ;;  %v2572_v45 = vld [vmem:[%s2790_s15 + $0x344] sm:$0xf]  ;;  %v2241_v46 = vld [vmem:[%s2790_s15 + $0x350] sm:$0xf0]  ;;  %v2116_v49 = vor.u32 %v2540_v43, %v2113_v44  ;;  %v2527_v28 = vld [vmem:[%s2790_s15 + $0x1d4] sm:$0xf0] }
  0x48   : > { %1223 = vmatpush.bf16.msrb.mxu3 %v2292_v10  ;;  %v2472_v50 = vld [vmem:[%s2790_s15 + $0x24] sm:$0xf]  ;;  %v1841_v51 = vld [vmem:[%s2790_s15 + $0x30] sm:$0xf0]  ;;  %v2244_v53 = vor.u32 %v2572_v45, %v2241_v46  ;;  %v2183_v29 = vld [vmem:[%s2790_s15 + $0x2c8] sm:$0xf] }
  0x49   : > { %1185 = vmatpush.bf16.msrb.mxu0 %v1892_v19  ;;  %v2504_v52 = vld [vmem:[%s2790_s15 + $0x124] sm:$0xf]  ;;  %v1969_v54 = vld [vmem:[%s2790_s15 + $0x130] sm:$0xf0]  ;;  %v1844_v59 = vor.u32 %v2472_v50, %v1841_v51  ;;  %v2595_v19 = vld [vmem:[%s2790_s15 + $0x3f4] sm:$0xf0] }
  0x4a   : > { %1198 = vmatpush.bf16.msrb.mxu1 %v2020_v22  ;;  %v2536_v55 = vld [vmem:[%s2790_s15 + $0x224] sm:$0xf]  ;;  %v2097_v56 = vld [vmem:[%s2790_s15 + $0x230] sm:$0xf0]  ;;  %v1972_v62 = vor.u32 %v2504_v52, %v1969_v54  ;;  %v2072_v22 = vor.u32 %v2531_v11, %v2071_v9  ;;  %v2559_v30 = vld [vmem:[%s2790_s15 + $0x2d4] sm:$0xf0] }
  0x4b   : > { %1211 = vmatpush.bf16.msrb.mxu2 %v2148_v23  ;;  %v2568_v57 = vld [vmem:[%s2790_s15 + $0x324] sm:$0xf]  ;;  %v2225_v58 = vld [vmem:[%s2790_s15 + $0x330] sm:$0xf0]  ;;  %v2100_v63 = vor.u32 %v2536_v55, %v2097_v56  ;;  %v2200_v23 = vor.u32 %v2563_v13, %v2199_v12  ;;  %v2311_v33 = vld [vmem:[%s2790_s15 + $0x3c8] sm:$0xf] }
  0x4c   : > { %1224 = vmatpush.bf16.msrb.mxu3 %v2276_v27  ;;  %v2468_v60 = vld [vmem:[%s2790_s15 + $0x4] sm:$0xf]  ;;  %v1825_v61 = vld [vmem:[%s2790_s15 + $0x10] sm:$0xf0]  ;;  %v2228_v3 = vor.u32 %v2568_v57, %v2225_v58  ;;  %v2328_v27 = vor.u32 %v2595_v19, %v2327_v18  ;;  %v2591_v34 = vld [vmem:[%s2790_s15 + $0x3d4] sm:$0xf0] }
  0x4d   : > { %1186 = vmatpush.bf16.msrb.mxu0 %v1876_v35  ;;  %v2500_v0 = vld [vmem:[%s2790_s15 + $0x104] sm:$0xf]  ;;  %v1953_v1 = vld [vmem:[%s2790_s15 + $0x110] sm:$0xf0]  ;;  %v1828_v10 = vor.u32 %v2468_v60, %v1825_v61  ;;  %v1928_v35 = vor.u32 %v2495_v25, %v1927_v24  ;;  %v1911_v38 = vld [vmem:[%s2790_s15 + $0xa8] sm:$0xf] }
  0x4e   : > { %1199 = vmatpush.bf16.msrb.mxu1 %v2004_v36  ;;  %v2532_v2 = vld [vmem:[%s2790_s15 + $0x204] sm:$0xf]  ;;  %v2081_v4 = vld [vmem:[%s2790_s15 + $0x210] sm:$0xf0]  ;;  %v1956_v14 = vor.u32 %v2500_v0, %v1953_v1  ;;  %v2056_v36 = vor.u32 %v2527_v28, %v2055_v26  ;;  %v2491_v39 = vld [vmem:[%s2790_s15 + $0xb4] sm:$0xf0] }
  0x4f   : > { %1212 = vmatpush.bf16.msrb.mxu2 %v2132_v37  ;;  %v2564_v5 = vld [vmem:[%s2790_s15 + $0x304] sm:$0xf]  ;;  %v2209_v6 = vld [vmem:[%s2790_s15 + $0x310] sm:$0xf0]  ;;  %v2084_v15 = vor.u32 %v2532_v2, %v2081_v4  ;;  %v2184_v37 = vor.u32 %v2559_v30, %v2183_v29  ;;  %v2039_v40 = vld [vmem:[%s2790_s15 + $0x1a8] sm:$0xf] }
  0x50   : > { %1225 = vmatpush.bf16.msrb.mxu3 %v2260_v41  ;;  %v2212_v20 = vor.u32 %v2564_v5, %v2209_v6  ;;  %v2312_v41 = vor.u32 %v2591_v34, %v2311_v33  ;;  %v2523_v42 = vld [vmem:[%s2790_s15 + $0x1b4] sm:$0xf0]  ;;  %v2167_v43 = vld [vmem:[%s2790_s15 + $0x2a8] sm:$0xf] }
  0x51   : > { %1187 = vmatpush.bf16.msrb.mxu0 %v1860_v47  ;;  %v2555_v44 = vld [vmem:[%s2790_s15 + $0x2b4] sm:$0xf0]  ;;  %v2295_v45 = vld [vmem:[%s2790_s15 + $0x3a8] sm:$0xf]  ;;  %v1912_v47 = vor.u32 %v2491_v39, %v1911_v38 }
  0x52   : > { %1200 = vmatpush.bf16.msrb.mxu1 %v1988_v48  ;;  %v2587_v46 = vld [vmem:[%s2790_s15 + $0x3b4] sm:$0xf0]  ;;  %v2040_v48 = vor.u32 %v2523_v42, %v2039_v40  ;;  %v1895_v50 = vld [vmem:[%s2790_s15 + $0x88] sm:$0xf] }
  0x53   : > { %1213 = vmatpush.bf16.msrb.mxu2 %v2116_v49  ;;  %v2168_v49 = vor.u32 %v2555_v44, %v2167_v43  ;;  %v2487_v51 = vld [vmem:[%s2790_s15 + $0x94] sm:$0xf0]  ;;  %v2023_v52 = vld [vmem:[%s2790_s15 + $0x188] sm:$0xf] }
  0x54   : > { %1226 = vmatpush.bf16.msrb.mxu3 %v2244_v53  ;;  %v2296_v53 = vor.u32 %v2587_v46, %v2295_v45  ;;  %v2519_v54 = vld [vmem:[%s2790_s15 + $0x194] sm:$0xf0]  ;;  %v2151_v55 = vld [vmem:[%s2790_s15 + $0x288] sm:$0xf] }
  0x55   : > { %1188 = vmatpush.bf16.msrb.mxu0 %v1844_v59  ;;  %v2551_v56 = vld [vmem:[%s2790_s15 + $0x294] sm:$0xf0]  ;;  %v2279_v57 = vld [vmem:[%s2790_s15 + $0x388] sm:$0xf]  ;;  %v1896_v59 = vor.u32 %v2487_v51, %v1895_v50  ;;  %v2024_v60 = vor.u32 %v2519_v54, %v2023_v52  ;;  %v2073_v51 = vld [vmem:[%s2790_s15 + $0x1f8] sm:$0xf0] }
  0x56   : > { %1201 = vmatpush.bf16.msrb.mxu1 %v1972_v62  ;;  %v2583_v58 = vld [vmem:[%s2790_s15 + $0x394] sm:$0xf0]  ;;  %v2152_v61 = vor.u32 %v2551_v56, %v2151_v55  ;;  %v1879_v62 = vld [vmem:[%s2790_s15 + $0x68] sm:$0xf]  ;;  %v2561_v52 = vld [vmem:[%s2790_s15 + $0x2ec] sm:$0xf] }
  0x57   : > { %1214 = vmatpush.bf16.msrb.mxu2 %v2100_v63  ;;  %v2483_v63 = vld [vmem:[%s2790_s15 + $0x74] sm:$0xf0]  ;;  %v2007_v0 = vld [vmem:[%s2790_s15 + $0x168] sm:$0xf]  ;;  %v2280_v1 = vor.u32 %v2583_v58, %v2279_v57  ;;  %v2593_v56 = vld [vmem:[%s2790_s15 + $0x3ec] sm:$0xf] }
  0x58   : > { %1227 = vmatpush.bf16.msrb.mxu3 %v2228_v3  ;;  %v2515_v2 = vld [vmem:[%s2790_s15 + $0x174] sm:$0xf0]  ;;  %v2135_v3 = vld [vmem:[%s2790_s15 + $0x268] sm:$0xf]  ;;  %v1880_v7 = vor.u32 %v2483_v63, %v1879_v62  ;;  %v2329_v57 = vld [vmem:[%s2790_s15 + $0x3f8] sm:$0xf0] }
  0x59   : > { %1189 = vmatpush.bf16.msrb.mxu0 %v1828_v10  ;;  %v2547_v4 = vld [vmem:[%s2790_s15 + $0x274] sm:$0xf0]  ;;  %v2263_v5 = vld [vmem:[%s2790_s15 + $0x368] sm:$0xf]  ;;  %v2008_v8 = vor.u32 %v2515_v2, %v2007_v0  ;;  %v2493_v62 = vld [vmem:[%s2790_s15 + $0xcc] sm:$0xf] }
  0x5a   : > { %1202 = vmatpush.bf16.msrb.mxu1 %v1956_v14  ;;  %v2579_v6 = vld [vmem:[%s2790_s15 + $0x374] sm:$0xf0]  ;;  %v2136_v9 = vor.u32 %v2547_v4, %v2135_v3  ;;  %v1863_v10 = vld [vmem:[%s2790_s15 + $0x48] sm:$0xf]  ;;  %v1929_v63 = vld [vmem:[%s2790_s15 + $0xd8] sm:$0xf0] }
  0x5b   : > { %1215 = vmatpush.bf16.msrb.mxu2 %v2084_v15  ;;  %v2479_v11 = vld [vmem:[%s2790_s15 + $0x54] sm:$0xf0]  ;;  %v1991_v12 = vld [vmem:[%s2790_s15 + $0x148] sm:$0xf]  ;;  %v2264_v13 = vor.u32 %v2579_v6, %v2263_v5  ;;  %v2525_v0 = vld [vmem:[%s2790_s15 + $0x1cc] sm:$0xf] }
  0x5c   : > { %1228 = vmatpush.bf16.msrb.mxu3 %v2212_v20  ;;  %1190 = vmatmul.bf16.vlgmr.msrb.gmra.mxu0 %v2902_v31  ;;  %v2511_v14 = vld [vmem:[%s2790_s15 + $0x154] sm:$0xf0]  ;;  %v2119_v15 = vld [vmem:[%s2790_s15 + $0x248] sm:$0xf]  ;;  %v2057_v2 = vld [vmem:[%s2790_s15 + $0x1d8] sm:$0xf0] }
  0x5d   : > { %1234 = vmatpush.bf16.msra.mxu0 %v1944_v21  ;;  %1203 = vmatmul.bf16.vlgmr.msrb.gmra.mxu1 %v2904_v32  ;;  %v2543_v18 = vld [vmem:[%s2790_s15 + $0x254] sm:$0xf0]  ;;  %v2247_v19 = vld [vmem:[%s2790_s15 + $0x348] sm:$0xf]  ;;  %v1864_v21 = vor.u32 %v2479_v11, %v1863_v10  ;;  %v2557_v3 = vld [vmem:[%s2790_s15 + $0x2cc] sm:$0xf] }
  0x5e   : > { %1247 = vmatpush.bf16.msra.mxu1 %v2072_v22  ;;  %1216 = vmatmul.bf16.vlgmr.msrb.gmra.mxu2 %v2890_v16  ;;  %v2575_v20 = vld [vmem:[%s2790_s15 + $0x354] sm:$0xf0]  ;;  %v1992_v22 = vor.u32 %v2511_v14, %v1991_v12  ;;  %v1847_v24 = vld [vmem:[%s2790_s15 + $0x28] sm:$0xf]  ;;  %v2185_v4 = vld [vmem:[%s2790_s15 + $0x2d8] sm:$0xf0] }
  0x5f   : > { %1260 = vmatpush.bf16.msra.mxu2 %v2200_v23  ;;  %1229 = vmatmul.bf16.vlgmr.msrb.gmra.mxu3 %v2892_v17  ;;  %v2120_v23 = vor.u32 %v2543_v18, %v2119_v15  ;;  %v2475_v25 = vld [vmem:[%s2790_s15 + $0x34] sm:$0xf0]  ;;  %v1975_v26 = vld [vmem:[%s2790_s15 + $0x128] sm:$0xf]  ;;  %v2589_v5 = vld [vmem:[%s2790_s15 + $0x3cc] sm:$0xf] }
  0x60   : > { %1273 = vmatpush.bf16.msra.mxu3 %v2328_v27  ;;  %v2248_v27 = vor.u32 %v2575_v20, %v2247_v19  ;;  %v2507_v28 = vld [vmem:[%s2790_s15 + $0x134] sm:$0xf0]  ;;  %v2103_v29 = vld [vmem:[%s2790_s15 + $0x228] sm:$0xf]  ;;  %v2313_v6 = vld [vmem:[%s2790_s15 + $0x3d8] sm:$0xf0] }
  0x61   : > { %1235 = vmatpush.bf16.msra.mxu0 %v1928_v35  ;;  %v2539_v30 = vld [vmem:[%s2790_s15 + $0x234] sm:$0xf0]  ;;  %v2231_v33 = vld [vmem:[%s2790_s15 + $0x328] sm:$0xf]  ;;  %v1848_v35 = vor.u32 %v2475_v25, %v1847_v24  ;;  %v1976_v38 = vor.u32 %v2507_v28, %v1975_v26  ;;  %v2489_v10 = vld [vmem:[%s2790_s15 + $0xac] sm:$0xf] }
  0x62   : > { %1248 = vmatpush.bf16.msra.mxu1 %v2056_v36  ;;  %v2571_v34 = vld [vmem:[%s2790_s15 + $0x334] sm:$0xf0]  ;;  %v1831_v36 = vld [vmem:[%s2790_s15 + $0x8] sm:$0xf]  ;;  %v2104_v39 = vor.u32 %v2539_v30, %v2103_v29  ;;  %v1913_v11 = vld [vmem:[%s2790_s15 + $0xb8] sm:$0xf0] }
  0x63   : > { %1261 = vmatpush.bf16.msra.mxu2 %v2184_v37  ;;  %v2471_v37 = vld [vmem:[%s2790_s15 + $0x14] sm:$0xf0]  ;;  %v1959_v40 = vld [vmem:[%s2790_s15 + $0x108] sm:$0xf]  ;;  %v2232_v43 = vor.u32 %v2571_v34, %v2231_v33  ;;  %v2521_v12 = vld [vmem:[%s2790_s15 + $0x1ac] sm:$0xf] }
  0x64   : > { %1274 = vmatpush.bf16.msra.mxu3 %v2312_v41  ;;  %v2503_v41 = vld [vmem:[%s2790_s15 + $0x114] sm:$0xf0]  ;;  %v2087_v42 = vld [vmem:[%s2790_s15 + $0x208] sm:$0xf]  ;;  %v1832_v50 = vor.u32 %v2471_v37, %v1831_v36  ;;  %v2041_v14 = vld [vmem:[%s2790_s15 + $0x1b8] sm:$0xf0] }
  0x65   : > { %1236 = vmatpush.bf16.msra.mxu0 %v1912_v47  ;;  %v2535_v44 = vld [vmem:[%s2790_s15 + $0x214] sm:$0xf0]  ;;  %v2215_v45 = vld [vmem:[%s2790_s15 + $0x308] sm:$0xf]  ;;  %v2497_v47 = vld [vmem:[%s2790_s15 + $0xec] sm:$0xf]  ;;  %v1960_v54 = vor.u32 %v2503_v41, %v1959_v40 }
  0x66   : > { %1249 = vmatpush.bf16.msra.mxu1 %v2040_v48  ;;  %v2567_v46 = vld [vmem:[%s2790_s15 + $0x314] sm:$0xf0]  ;;  %v1945_v48 = vld [vmem:[%s2790_s15 + $0xf8] sm:$0xf0]  ;;  %v2088_v55 = vor.u32 %v2535_v44, %v2087_v42  ;;  %v2553_v15 = vld [vmem:[%s2790_s15 + $0x2ac] sm:$0xf] }
  0x67   : > { %1262 = vmatpush.bf16.msra.mxu2 %v2168_v49  ;;  %v2529_v49 = vld [vmem:[%s2790_s15 + $0x1ec] sm:$0xf]  ;;  %v2216_v58 = vor.u32 %v2567_v46, %v2215_v45  ;;  %v2169_v18 = vld [vmem:[%s2790_s15 + $0x2b8] sm:$0xf0] }
  0x68   : > { %1275 = vmatpush.bf16.msra.mxu3 %v2296_v53  ;;  %v2201_v53 = vld [vmem:[%s2790_s15 + $0x2f8] sm:$0xf0]  ;;  %v2585_v19 = vld [vmem:[%s2790_s15 + $0x3ac] sm:$0xf] }
  0x69   : > { %1237 = vmatpush.bf16.msra.mxu0 %v1896_v59  ;;  %v1948_v59 = vor.u32 %v2497_v47, %v1945_v48  ;;  %v2297_v20 = vld [vmem:[%s2790_s15 + $0x3b8] sm:$0xf0]  ;;  %v2485_v24 = vld [vmem:[%s2790_s15 + $0x8c] sm:$0xf] }
  0x6a   : > { %1250 = vmatpush.bf16.msra.mxu1 %v2024_v60  ;;  %v2076_v60 = vor.u32 %v2529_v49, %v2073_v51  ;;  %v1897_v25 = vld [vmem:[%s2790_s15 + $0x98] sm:$0xf0]  ;;  %v2517_v26 = vld [vmem:[%s2790_s15 + $0x18c] sm:$0xf] }
  0x6b   : > { %1263 = vmatpush.bf16.msra.mxu2 %v2152_v61  ;;  %v2204_v61 = vor.u32 %v2561_v52, %v2201_v53  ;;  %v2025_v28 = vld [vmem:[%s2790_s15 + $0x198] sm:$0xf0]  ;;  %v2549_v29 = vld [vmem:[%s2790_s15 + $0x28c] sm:$0xf] }
  0x6c   : > { %1276 = vmatpush.bf16.msra.mxu3 %v2280_v1  ;;  %v2332_v1 = vor.u32 %v2593_v56, %v2329_v57  ;;  %v2153_v30 = vld [vmem:[%s2790_s15 + $0x298] sm:$0xf0]  ;;  %v2581_v33 = vld [vmem:[%s2790_s15 + $0x38c] sm:$0xf]  ;;  %v2028_v36 = vor.u32 %v2517_v26, %v2025_v28 }
  0x6d   : > { %1238 = vmatpush.bf16.msra.mxu0 %v1880_v7  ;;  %v1932_v7 = vor.u32 %v2493_v62, %v1929_v63  ;;  %v2281_v34 = vld [vmem:[%s2790_s15 + $0x398] sm:$0xf0]  ;;  %v2156_v37 = vor.u32 %v2549_v29, %v2153_v30  ;;  %v2513_v40 = vld [vmem:[%s2790_s15 + $0x16c] sm:$0xf] }
  0x6e   : > { %1251 = vmatpush.bf16.msra.mxu1 %v2008_v8  ;;  %v2060_v8 = vor.u32 %v2525_v0, %v2057_v2  ;;  %v2284_v41 = vor.u32 %v2581_v33, %v2281_v34  ;;  %v2009_v42 = vld [vmem:[%s2790_s15 + $0x178] sm:$0xf0]  ;;  %v2577_v45 = vld [vmem:[%s2790_s15 + $0x36c] sm:$0xf]  ;;  %v342_v33 = vld [vmem:[#allocation2] sm:$0xff] }
  0x6f   : > { %1264 = vmatpush.bf16.msra.mxu2 %v2136_v9  ;;  %v2188_v9 = vor.u32 %v2557_v3, %v2185_v4  ;;  %v2137_v44 = vld [vmem:[%s2790_s15 + $0x278] sm:$0xf0]  ;;  %v2012_v48 = vor.u32 %v2513_v40, %v2009_v42  ;;  %v2509_v52 = vld [vmem:[%s2790_s15 + $0x14c] sm:$0xf] }
  0x70   : > { %1277 = vmatpush.bf16.msra.mxu3 %v2264_v13  ;;  %v2316_v13 = vor.u32 %v2589_v5, %v2313_v6  ;;  %v2265_v46 = vld [vmem:[%s2790_s15 + $0x378] sm:$0xf0]  ;;  %v2573_v57 = vld [vmem:[%s2790_s15 + $0x34c] sm:$0xf] }
  0x71   : > { %1239 = vmatpush.bf16.msra.mxu0 %v1864_v21  ;;  %v1916_v21 = vor.u32 %v2489_v10, %v1913_v11  ;;  %v1865_v51 = vld [vmem:[%s2790_s15 + $0x58] sm:$0xf0]  ;;  %v2268_v53 = vor.u32 %v2577_v45, %v2265_v46  ;;  %v2473_v62 = vld [vmem:[%s2790_s15 + $0x2c] sm:$0xf] }
  0x72   : > { %1252 = vmatpush.bf16.msra.mxu1 %v1992_v22  ;;  %v2044_v22 = vor.u32 %v2521_v12, %v2041_v14  ;;  %v2121_v56 = vld [vmem:[%s2790_s15 + $0x258] sm:$0xf0]  ;;  %v2505_v0 = vld [vmem:[%s2790_s15 + $0x12c] sm:$0xf] }
  0x73   : > { %1265 = vmatpush.bf16.msra.mxu2 %v2120_v23  ;;  %v2172_v23 = vor.u32 %v2553_v15, %v2169_v18  ;;  %v1849_v63 = vld [vmem:[%s2790_s15 + $0x38] sm:$0xf0]  ;;  %v2537_v3 = vld [vmem:[%s2790_s15 + $0x22c] sm:$0xf] }
  0x74   : > { %1278 = vmatpush.bf16.msra.mxu3 %v2248_v27  ;;  %v2300_v27 = vor.u32 %v2585_v19, %v2297_v20  ;;  %v1977_v2 = vld [vmem:[%s2790_s15 + $0x138] sm:$0xf0]  ;;  %v2569_v5 = vld [vmem:[%s2790_s15 + $0x32c] sm:$0xf] }
  0x75   : > { %1240 = vmatpush.bf16.msra.mxu0 %v1848_v35  ;;  %v1900_v35 = vor.u32 %v2485_v24, %v1897_v25  ;;  %v2105_v4 = vld [vmem:[%s2790_s15 + $0x238] sm:$0xf0]  ;;  %v2469_v10 = vld [vmem:[%s2790_s15 + $0xc] sm:$0xf] }
  0x76   : > { %1253 = vmatpush.bf16.msra.mxu1 %v1976_v38  ;;  %v2481_v38 = vld [vmem:[%s2790_s15 + $0x6c] sm:$0xf]  ;;  %v2233_v6 = vld [vmem:[%s2790_s15 + $0x338] sm:$0xf0] }
  0x77   : > { %1266 = vmatpush.bf16.msra.mxu2 %v2104_v39  ;;  %v1881_v39 = vld [vmem:[%s2790_s15 + $0x78] sm:$0xf0]  ;;  %v2501_v12 = vld [vmem:[%s2790_s15 + $0x10c] sm:$0xf] }
  0x78   : > { %1279 = vmatpush.bf16.msra.mxu3 %v2232_v43  ;;  %v2545_v43 = vld [vmem:[%s2790_s15 + $0x26c] sm:$0xf]  ;;  %v1884_v47 = vor.u32 %v2481_v38, %v1881_v39  ;;  %v1833_v11 = vld [vmem:[%s2790_s15 + $0x18] sm:$0xf0] }
  0x79   : > { %1241 = vmatpush.bf16.msra.mxu0 %v1832_v50  ;;  %v2140_v49 = vor.u32 %v2545_v43, %v2137_v44  ;;  %v2477_v50 = vld [vmem:[%s2790_s15 + $0x4c] sm:$0xf]  ;;  %v1961_v14 = vld [vmem:[%s2790_s15 + $0x118] sm:$0xf0] }
  0x7a   : > { %1254 = vmatpush.bf16.msra.mxu1 %v1960_v54  ;;  %v1993_v54 = vld [vmem:[%s2790_s15 + $0x158] sm:$0xf0]  ;;  %v2533_v15 = vld [vmem:[%s2790_s15 + $0x20c] sm:$0xf] }
  0x7b   : > { %1267 = vmatpush.bf16.msra.mxu2 %v2088_v55  ;;  %v2541_v55 = vld [vmem:[%s2790_s15 + $0x24c] sm:$0xf]  ;;  %v2089_v18 = vld [vmem:[%s2790_s15 + $0x218] sm:$0xf0] }
  0x7c   : > { %1280 = vmatpush.bf16.msra.mxu3 %v2216_v58  ;;  %1242 = vmatmul.bf16.vlgmr.msra.gmra.mxu0 %v2902_v31  ;;  %v2249_v58 = vld [vmem:[%s2790_s15 + $0x358] sm:$0xf0]  ;;  %v2565_v19 = vld [vmem:[%s2790_s15 + $0x30c] sm:$0xf] }
  0x7d   : > { %1286 = vmatpush.bf16.msrb.mxu0 %v1948_v59  ;;  %1255 = vmatmul.bf16.vlgmr.msra.gmra.mxu1 %v2904_v32  ;;  %v1868_v59 = vor.u32 %v2477_v50, %v1865_v51  ;;  %v2217_v20 = vld [vmem:[%s2790_s15 + $0x318] sm:$0xf0]  ;;  %v343_v42 = vld [vmem:[#allocation2 + $0x8] sm:$0xff] }
  0x7e   : > { %1299 = vmatpush.bf16.msrb.mxu1 %v2076_v60  ;;  %1268 = vmatmul.bf16.vlgmr.msra.gmra.mxu2 %v2890_v16  ;;  %v1996_v60 = vor.u32 %v2509_v52, %v1993_v54  ;;  %v2220_v24 = vor.u32 %v2565_v19, %v2217_v20 }
  0x7f   : > { %1312 = vmatpush.bf16.msrb.mxu2 %v2204_v61  ;;  %1281 = vmatmul.bf16.vlgmr.msra.gmra.mxu3 %v2892_v17  ;;  %v2124_v61 = vor.u32 %v2541_v55, %v2121_v56  ;;  %v344_v55 = vld [vmem:[#allocation2 + $0x10] sm:$0xff] }
  0x80   : > { %1325 = vmatpush.bf16.msrb.mxu3 %v2332_v1  ;;  %v2252_v1 = vor.u32 %v2573_v57, %v2249_v58 }
  0x81   : > { %1287 = vmatpush.bf16.msrb.mxu0 %v1932_v7  ;;  %v1852_v7 = vor.u32 %v2473_v62, %v1849_v63 }
  0x82   : > { %1300 = vmatpush.bf16.msrb.mxu1 %v2060_v8  ;;  %v1980_v8 = vor.u32 %v2505_v0, %v1977_v2 }
  0x83   : > { %1313 = vmatpush.bf16.msrb.mxu2 %v2188_v9  ;;  %v2108_v9 = vor.u32 %v2537_v3, %v2105_v4 }
  0x84   : > { %1326 = vmatpush.bf16.msrb.mxu3 %v2316_v13  ;;  %v2236_v13 = vor.u32 %v2569_v5, %v2233_v6  ;;  %v345_v5 = vld [vmem:[#allocation2 + $0x18] sm:$0xff] }
  0x85   : > { %1288 = vmatpush.bf16.msrb.mxu0 %v1916_v21  ;;  %v1836_v21 = vor.u32 %v2469_v10, %v1833_v11 }
  0x86   : > { %1301 = vmatpush.bf16.msrb.mxu1 %v2044_v22  ;;  %v1964_v22 = vor.u32 %v2501_v12, %v1961_v14 }
  0x87   : > { %1314 = vmatpush.bf16.msrb.mxu2 %v2172_v23  ;;  %v2092_v23 = vor.u32 %v2533_v15, %v2089_v18 }
  0x88   : > { %1327 = vmatpush.bf16.msrb.mxu3 %v2300_v27 }
  0x89   : > { %1289 = vmatpush.bf16.msrb.mxu0 %v1900_v35 }
  0x8a   : > { %1302 = vmatpush.bf16.msrb.mxu1 %v2028_v36 }
  0x8b   : > { %1315 = vmatpush.bf16.msrb.mxu2 %v2156_v37 }
  0x8c   : > { %1328 = vmatpush.bf16.msrb.mxu3 %v2284_v41 }
  0x8d   : > { %1290 = vmatpush.bf16.msrb.mxu0 %v1884_v47 }
  0x8e   : > { %1303 = vmatpush.bf16.msrb.mxu1 %v2012_v48 }
  0x8f   : > { %1316 = vmatpush.bf16.msrb.mxu2 %v2140_v49 }
  0x90   : > { %1329 = vmatpush.bf16.msrb.mxu3 %v2268_v53 }
  0x91   : > { %1291 = vmatpush.bf16.msrb.mxu0 %v1868_v59 }
  0x92   : > { %1304 = vmatpush.bf16.msrb.mxu1 %v1996_v60 }
  0x93   : > { %1317 = vmatpush.bf16.msrb.mxu2 %v2124_v61 }
  0x94   : > { %1330 = vmatpush.bf16.msrb.mxu3 %v2252_v1 }
  0x95   : > { %1292 = vmatpush.bf16.msrb.mxu0 %v1852_v7 }
  0x96   : > { %1305 = vmatpush.bf16.msrb.mxu1 %v1980_v8 }
  0x97   : > { %1318 = vmatpush.bf16.msrb.mxu2 %v2108_v9 }
  0x98   : > { %1331 = vmatpush.bf16.msrb.mxu3 %v2236_v13 }
  0x99   : > { %1293 = vmatpush.bf16.msrb.mxu0 %v1836_v21 }
  0x9a   : > { %1306 = vmatpush.bf16.msrb.mxu1 %v1964_v22 }
  0x9b   : > { %1319 = vmatpush.bf16.msrb.mxu2 %v2092_v23 }
  0x9c   : > { %1332 = vmatpush.bf16.msrb.mxu3 %v2220_v24  ;;  %1294 = vmatmul.bf16.vlgmr.msrb.gmra.mxu0 %v2902_v31 }
  0x9d   : > { %1307 = vmatmul.bf16.vlgmr.msrb.gmra.mxu1 %v2904_v32 }
  0x9e   : > { %1320 = vmatmul.bf16.vlgmr.msrb.gmra.mxu2 %v2890_v16 }
  0x9f   : > { %1333 = vmatmul.bf16.vlgmr.msrb.gmra.mxu3 %v2892_v17 }
  0xc1   : > { %v1152_v25 = vpop.f32.mrf.mxu1 }
  0xc2   : > { %v1178_v30 = vpop.f32.mrf.mxu3 }
  0xc3   : > { %v1139_v26 = vpop.f32.mrf.mxu0  ;;  %v1165_v28 = vpop.f32.mrf.mxu2 }
  0xc4   : > { %v1153_v27 = vadd.f32 %v1152_v25, %v1139_v26 }
  0xc6   : > { %v1166_v29 = vadd.f32 %v1165_v28, %v1153_v27 }
  0xc8   : > { %v1179_v34 = vadd.f32 %v1178_v30, %v1166_v29 }
  0xc9   : > { %v1154_v35 = vpop.f32.mrf.mxu1 }
  0xca   : > { %v1338_v36 = vadd.f32 %v1179_v34, %v342_v33  ;;  %v1180_v31 = vpop.f32.mrf.mxu3 }
  0xcb   : > { %v1141_v37 = vpop.f32.mrf.mxu0  ;;  %v1167_v38 = vpop.f32.mrf.mxu2 }
  0xcc   : > { %1342 = vst [vmem:[#allocation2] sm:$0xff] %v1338_v36 }
  0xd9   : > { %v1191_v39 = vpop.f32.mrf.mxu0 }
  0xda   : > { %v1204_v32 = vpop.f32.mrf.mxu1 }
  0xdb   : > { %v1205_v40 = vadd.f32 %v1204_v32, %v1191_v39 }
  0xe1   : > { %v1217_v16 = vpop.f32.mrf.mxu2  ;;  %v1193_v44 = vpop.f32.mrf.mxu0 }
  0xe2   : > { %v1218_v41 = vadd.f32 %v1217_v16, %v1205_v40  ;;  %v1230_v17 = vpop.f32.mrf.mxu3  ;;  %v1206_v45 = vpop.f32.mrf.mxu1 }
  0xe4   : > { %v1231_v43 = vadd.f32 %v1230_v17, %v1218_v41 }
  0xe6   : > { %v1339_v46 = vadd.f32 %v1231_v43, %v343_v42 }
  0xe8   : > { %1343 = vst [vmem:[#allocation2 + $0x8] sm:$0xff] %v1339_v46 }
  0xe9   : > { %v1219_v47 = vpop.f32.mrf.mxu2 }
  0xea   : > { %v1232_v48 = vpop.f32.mrf.mxu3 }
  0xf9   : > { %v1243_v49 = vpop.f32.mrf.mxu0 }
  0xfa   : > { %v1256_v50 = vpop.f32.mrf.mxu1 }
  0xfb   : > { %v1257_v51 = vadd.f32 %v1256_v50, %v1243_v49 }
 0x101   : > { %v1269_v52 = vpop.f32.mrf.mxu2  ;;  %v1245_v57 = vpop.f32.mrf.mxu0 }
 0x102   : > { %v1270_v53 = vadd.f32 %v1269_v52, %v1257_v51  ;;  %v1282_v54 = vpop.f32.mrf.mxu3  ;;  %v1258_v58 = vpop.f32.mrf.mxu1 }
 0x104   : > { %v1283_v56 = vadd.f32 %v1282_v54, %v1270_v53 }
 0x106   : > { %v1340_v59 = vadd.f32 %v1283_v56, %v344_v55 }
 0x108   : > { %1344 = vst [vmem:[#allocation2 + $0x10] sm:$0xff] %v1340_v59 }
 0x109   : > { %v1271_v60 = vpop.f32.mrf.mxu2 }
 0x10a   : > { %v1284_v61 = vpop.f32.mrf.mxu3 }
 0x119   : > { %v1295_v62 = vpop.f32.mrf.mxu0 }
 0x11a   : > { %v1308_v63 = vpop.f32.mrf.mxu1 }
 0x11b   : > { %v1309_v0 = vadd.f32 %v1308_v63, %v1295_v62 }
 0x121   : > { %v1321_v1 = vpop.f32.mrf.mxu2  ;;  %v1297_v4 = vpop.f32.mrf.mxu0 }
 0x122   : > { %v1322_v2 = vadd.f32 %v1321_v1, %v1309_v0  ;;  %v1334_v3 = vpop.f32.mrf.mxu3  ;;  %v1310_v6 = vpop.f32.mrf.mxu1 }
 0x124   : > { %v1335_v7 = vadd.f32 %v1334_v3, %v1322_v2 }
 0x126   : > { %v1341_v8 = vadd.f32 %v1335_v7, %v345_v5  ;;  %1349 = sbr.rel (%p2333_p7) target bundleno = 474 (0x1da), region = 52 }
 0x128   : > { %1345 = vst [vmem:[#allocation2 + $0x18] sm:$0xff] %v1341_v8 }
 0x129   : > { %v1323_v9 = vpop.f32.mrf.mxu2 }
 0x12a   : > { %v1336_v10 = vpop.f32.mrf.mxu3 }
 0x12b   : > { %v2603_v11 = vld [vmem:[%s3202_s4 + $0x38] sm:$0xff]  ;;  %v2602_v15 = vld [vmem:[%s3202_s4 + $0x30] sm:$0xff]  ;;  %v2601_v21 = vld [vmem:[%s3202_s4 + $0x28] sm:$0xff] }
 0x12c   : > { %v2611_v12 = vld [vmem:[%s3202_s4 + $0x78] sm:$0xff]  ;;  %1650 = vmatpush.bf16.msra.mxu0 %v2603_v11  ;;  %v2610_v18 = vld [vmem:[%s3202_s4 + $0x70] sm:$0xff]  ;;  %v2609_v22 = vld [vmem:[%s3202_s4 + $0x68] sm:$0xff] }
 0x12d   : > { %v2619_v13 = vld [vmem:[%s3202_s4 + $0xb8] sm:$0xff]  ;;  %1663 = vmatpush.bf16.msra.mxu1 %v2611_v12  ;;  %v2618_v19 = vld [vmem:[%s3202_s4 + $0xb0] sm:$0xff]  ;;  %v2617_v23 = vld [vmem:[%s3202_s4 + $0xa8] sm:$0xff] }
 0x12e   : > { %v2627_v14 = vld [vmem:[%s3202_s4 + $0xf8] sm:$0xff]  ;;  %1676 = vmatpush.bf16.msra.mxu2 %v2619_v13  ;;  %v2626_v20 = vld [vmem:[%s3202_s4 + $0xf0] sm:$0xff]  ;;  %v2625_v24 = vld [vmem:[%s3202_s4 + $0xe8] sm:$0xff] }
 0x12f   : > { %1689 = vmatpush.bf16.msra.mxu3 %v2627_v14  ;;  %v2600_v25 = vld [vmem:[%s3202_s4 + $0x20] sm:$0xff]  ;;  %v1351_v34 = vld [vmem:[#allocation2 + $0x8] sm:$0xff]  ;;  %v1352_v38 = vld [vmem:[#allocation2 + $0x10] sm:$0xff] }
 0x130   : > { %1651 = vmatpush.bf16.msra.mxu0 %v2602_v15  ;;  %v2608_v26 = vld [vmem:[%s3202_s4 + $0x60] sm:$0xff]  ;;  %v1353_v31 = vld [vmem:[#allocation2 + $0x18] sm:$0xff]  ;;  %v2598_v51 = vld [vmem:[%s3202_s4 + $0x10] sm:$0xff] }
 0x131   : > { %1664 = vmatpush.bf16.msra.mxu1 %v2610_v18  ;;  %v2616_v27 = vld [vmem:[%s3202_s4 + $0xa0] sm:$0xff]  ;;  %v2599_v16 = vld [vmem:[%s3202_s4 + $0x18] sm:$0xff]  ;;  %v2606_v52 = vld [vmem:[%s3202_s4 + $0x50] sm:$0xff] }
 0x132   : > { %1677 = vmatpush.bf16.msra.mxu2 %v2618_v19  ;;  %v2624_v28 = vld [vmem:[%s3202_s4 + $0xe0] sm:$0xff]  ;;  %v2607_v41 = vld [vmem:[%s3202_s4 + $0x58] sm:$0xff]  ;;  %v2614_v54 = vld [vmem:[%s3202_s4 + $0x90] sm:$0xff] }
 0x133   : > { %1690 = vmatpush.bf16.msra.mxu3 %v2626_v20  ;;  %v1350_v29 = vld [vmem:[#allocation2] sm:$0xff]  ;;  %v2615_v44 = vld [vmem:[%s3202_s4 + $0x98] sm:$0xff]  ;;  %v2622_v55 = vld [vmem:[%s3202_s4 + $0xd0] sm:$0xff] }
 0x134   : > { %1652 = vmatpush.bf16.msra.mxu0 %v2601_v21  ;;  %v1354_v30 = vld [vmem:[%s3200_s2] sm:$0xf]  ;;  %v2623_v45 = vld [vmem:[%s3202_s4 + $0xd8] sm:$0xff]  ;;  %v2597_v57 = vld [vmem:[%s3202_s4 + $0x8] sm:$0xff] }
 0x135   : > { %1665 = vmatpush.bf16.msra.mxu1 %v2609_v22  ;;  %v1368_v33 = vld [vmem:[%s3201_s3] sm:$0xf]  ;;  %v1356_v35 = vperm.slane %v1354_v30, 0  ;;  %v1357_v37 = vperm.slane %v1354_v30, 1  ;;  %v1358_v32 = vperm.slane %v1354_v30, 2  ;;  %v1359_v40 = vperm.slane %v1354_v30, 3 }
 0x136   : > { %1678 = vmatpush.bf16.msra.mxu2 %v2617_v23  ;;  %v1370_v36 = vperm.slane %v1368_v33, 0  ;;  %v1371_v39 = vperm.slane %v1368_v33, 1  ;;  %v1372_v43 = vperm.slane %v1368_v33, 2  ;;  %v1373_v48 = vperm.slane %v1368_v33, 3  ;;  %v2605_v58 = vld [vmem:[%s3202_s4 + $0x48] sm:$0xff]  ;;  %v2596_v61 = vld [vmem:[%s3202_s4] sm:$0xff] }
 0x137   : > { %1691 = vmatpush.bf16.msra.mxu3 %v2625_v24  ;;  %v1364_v17 = vmul.f32 %v1356_v35, %v1350_v29  ;;  %v1365_v42 = vmul.f32 %v1357_v37, %v1351_v34  ;;  %v1366_v46 = vmul.f32 %v1358_v32, %v1352_v38  ;;  %v1367_v47 = vmul.f32 %v1359_v40, %v1353_v31  ;;  %v2613_v59 = vld [vmem:[%s3202_s4 + $0x88] sm:$0xff]  ;;  %v2604_v62 = vld [vmem:[%s3202_s4 + $0x40] sm:$0xff] }
 0x138   : > { %1653 = vmatpush.bf16.msra.mxu0 %v2600_v25  ;;  %v2621_v60 = vld [vmem:[%s3202_s4 + $0xc8] sm:$0xff]  ;;  %v2612_v63 = vld [vmem:[%s3202_s4 + $0x80] sm:$0xff] }
 0x139   : > { %1666 = vmatpush.bf16.msra.mxu1 %v2608_v26  ;;  %v1378_v49 = vadd.f32 %v1370_v36, %v1364_v17  ;;  %v1379_v50 = vadd.f32 %v1371_v39, %v1365_v42  ;;  %v1380_v53 = vadd.f32 %v1372_v43, %v1366_v46  ;;  %v1381_v56 = vadd.f32 %v1373_v48, %v1367_v47  ;;  %v2620_v0 = vld [vmem:[%s3202_s4 + $0xc0] sm:$0xff] }
 0x13a   : > { %1679 = vmatpush.bf16.msra.mxu2 %v2616_v27  ;;  %v2660_v5 = vld [vmem:[%s3203_s5] ss:$0 sm:$0xff] }
 0x13b   : > { %1692 = vmatpush.bf16.msra.mxu3 %v2624_v28  ;;  %1382 = vst [vmem:[#allocation2] sm:$0xff] %v1378_v49  ;;  %v1386_v1 = vpack.c.bf16 %v1378_v49, %v1378_v49  ;;  %v1387_v2 = vpack.c.bf16 %v1379_v50, %v1379_v50  ;;  %v1388_v3 = vpack.c.bf16 %v1380_v53, %v1380_v53 }
 0x13c   : > { %1654 = vmatpush.bf16.msra.mxu0 %v2599_v16  ;;  %1383 = vst [vmem:[#allocation2 + $0x8] sm:$0xff] %v1379_v50  ;;  %v1389_v4 = vpack.c.bf16 %v1381_v56, %v1381_v56 }
 0x13d   : > { %1667 = vmatpush.bf16.msra.mxu1 %v2607_v41  ;;  %1384 = vst [vmem:[#allocation2 + $0x10] sm:$0xff] %v1380_v53 }
 0x13e   : > { %1680 = vmatpush.bf16.msra.mxu2 %v2615_v44  ;;  %1385 = vst [vmem:[#allocation2 + $0x18] sm:$0xff] %v1381_v56 }
 0x13f   : > { %1693 = vmatpush.bf16.msra.mxu3 %v2623_v45 }
 0x140   : > { %1655 = vmatpush.bf16.msra.mxu0 %v2598_v51 }
 0x141   : > { %1668 = vmatpush.bf16.msra.mxu1 %v2606_v52 }
 0x142   : > { %1681 = vmatpush.bf16.msra.mxu2 %v2614_v54 }
 0x143   : > { %1694 = vmatpush.bf16.msra.mxu3 %v2622_v55 }
 0x144   : > { %1656 = vmatpush.bf16.msra.mxu0 %v2597_v57 }
 0x145   : > { %1669 = vmatpush.bf16.msra.mxu1 %v2605_v58 }
 0x146   : > { %1682 = vmatpush.bf16.msra.mxu2 %v2613_v59 }
 0x147   : > { %1695 = vmatpush.bf16.msra.mxu3 %v2621_v60 }
 0x148   : > { %1657 = vmatpush.bf16.msra.mxu0 %v2596_v61 }
 0x149   : > { %1670 = vmatpush.bf16.msra.mxu1 %v2604_v62 }
 0x14a   : > { %1683 = vmatpush.bf16.msra.mxu2 %v2612_v63 }
 0x14b   : > { %1696 = vmatpush.bf16.msra.mxu3 %v2620_v0  ;;  %1658 = vmatmul.bf16.vlgmr.msra.gmra.mxu0 %v1386_v1 }
 0x14c   : > { %1671 = vmatmul.bf16.vlgmr.msra.gmra.mxu1 %v1387_v2 }
 0x14d   : > { %1684 = vmatmul.bf16.vlgmr.msra.gmra.mxu2 %v1388_v3 }
 0x14e   : > { %1697 = vmatmul.bf16.vlgmr.msra.gmra.mxu3 %v1389_v4 }
 0x1c8   : > { %v1659_v6 = vpop.f32.mrf.mxu0 }
 0x1c9   : > { %v1672_v7 = vpop.f32.mrf.mxu1  ;;  %v1660_v8 = vadd.f32 %v2660_v5, %v1659_v6 }
 0x1cb   : > { %v1673_v9 = vadd.f32 %v1672_v7, %v1660_v8 }
 0x1d0   : > { %v1685_v10 = vpop.f32.mrf.mxu2  ;;  %v1661_v13 = vpop.f32.mrf.mxu0 }
 0x1d1   : > { %v1698_v11 = vpop.f32.mrf.mxu3  ;;  %v1686_v12 = vadd.f32 %v1685_v10, %v1673_v9  ;;  %v1674_v14 = vpop.f32.mrf.mxu1 }
 0x1d3   : > { %v1699_v15 = vadd.f32 %v1698_v11, %v1686_v12 }
 0x1d5   : > { %1702 = vst [vmem:[%s3204_s6] sm:$0xff] %v1699_v15 }
 0x1d8   : > { %v1687_v18 = vpop.f32.mrf.mxu2 }
 0x1d9   : > { %v1700_v19 = vpop.f32.mrf.mxu3 }
 0x1da PF: > { %p2632_p8 = scmp.eq.s32.totalorder %s1811_s27, 1  ;;  %s1721_s14 = sshll.u32 %s3205_s7, 4  ;;  %s1722_s14 = int_to_ptr.hbm [resolvable:$true] %s1721_s14 }
 0x1db   : > { %s2718_s15 = smov [#allocation2]  }
 0x1dc   : > { %s1719_s16 = sshll.u32 %s2718_s15, 4  ;;  %s1720_s16 = int_to_ptr.vmem [resolvable:$true] %s1719_s16 }
 0x1dd   : > { %2629 = dma.vmem_to_hbm [thread:$0]  (%p2632_p8), %s1720_s16, 512, %s1722_s14, [#allocation3]  }
 0x1de   : > { %2702 = dma.done.wait (%p2632_p8), [#allocation3], 512  }
 0x1df   : > { %2704 = vsyncadd (%p2632_p8), [#allocation3], 4294966784 }
 0x1e0 PF: > { %s19_s26 = sadd.s32 1, %s2715_s26   ;;  %s3206_s24 = smov %s2711_s25 }
 0x1e1   : > { %p16_p9 = scmp.ge.s32.totalorder %s19_s26, 4   ;;  %s3207_s25 = smov %s3209_s28 }
 0x1e3   :  { %18 = sbr.rel (!%p16_p9) target bundleno = 2 (0x2), region = 95 }
 0x1e8   :  { %1742 = vsyncpa [#allocation3], 1 }
 0x1e9   :  { %1744 = vsyncpa [#allocation3 + $0x1], 1 }

</bundles_post_ra>
